<compile_context>
chip_gen: v6e
topology: v6e:2x2x1
jax: 0.10.0
libtpu: 0.0.40
codegen_flags: <defaults>
</compile_context>

<pallas_src>
import math

import jax
import jax.numpy as jnp
from jax.experimental import pallas as pl
from jax.experimental.pallas import tpu as pltpu

_LANE_PAD = 128          # lane-dense output width (out_features padded 3 -> 128)
_DEFAULT_BLOCK_B = 512   # batch tile when tiling kicks in (fits v7x 64 MiB VMEM budget)


def _stance_kernel(x_ref, w_ref, b_ref, o_ref):
    # x_ref: (TB, F)  w_ref: (F, 128)  b_ref: (1, 128)  o_ref: (TB, 128)
    x = x_ref[...]
    w = w_ref[...]
    b = b_ref[...]
    logits = jnp.dot(x, w, preferred_element_type=jnp.float32) + b
    o_ref[...] = jnp.maximum(logits, 0.0).astype(o_ref.dtype)


def prepare_params(weight, bias, lane_pad=_LANE_PAD):
    """One-time conversion from PyTorch (out, in) layout to kernel layout.

    Returns (w_padded, b_padded): weight transposed to (in, lane_pad) and bias as
    (1, lane_pad), both zero-padded in the output dimension so the kernel's output
    block is lane-dense. Call once at init time, not per forward.
    """
    out_f, in_f = weight.shape
    assert out_f <= lane_pad
    w_padded = jnp.zeros((in_f, lane_pad), jnp.float32).at[:, :out_f].set(weight.T)
    b_padded = jnp.zeros((1, lane_pad), jnp.float32).at[:, :out_f].set(bias)
    return w_padded, b_padded


def stance_classifier_forward(x, w_padded, b_padded, out_features=3,
                              block_b=_DEFAULT_BLOCK_B):
    """x: (B, in_features) f32; w_padded: (in_features, 128); b_padded: (1, 128)."""
    B, F = x.shape
    lane_pad = w_padded.shape[1]

    # Align batch to the 8-row sublane granularity (cheap, done in XLA).
    pad8 = (-B) % 8
    if pad8:
        x = jnp.pad(x, ((0, pad8), (0, 0)))
    Bp = B + pad8

    def _cost(rows):
        return pl.CostEstimate(
            flops=2 * rows * F * lane_pad,
            transcendentals=0,
            bytes_accessed=4 * (rows * F + F * lane_pad + lane_pad + rows * lane_pad),
        )

    if Bp <= block_b:
        # Small-batch fast path: everything fits in one VMEM block; no grid, so no
        # software-pipeline prologue/epilogue and no input double-buffering.
        out = pl.pallas_call(
            _stance_kernel,
            out_shape=jax.ShapeDtypeStruct((Bp, lane_pad), jnp.float32),
            in_specs=[
                pl.BlockSpec(memory_space=pltpu.MemorySpace.VMEM),
                pl.BlockSpec(memory_space=pltpu.MemorySpace.VMEM),
                pl.BlockSpec(memory_space=pltpu.MemorySpace.VMEM),
            ],
            out_specs=pl.BlockSpec(memory_space=pltpu.MemorySpace.VMEM),
            cost_estimate=_cost(Bp),
        )(x, w_padded, b_padded)
        return out[:B, :out_features]

    # Large-batch path: tile the batch axis; weight/bias stay resident across tiles.
    pad_tile = (-Bp) % block_b
    if pad_tile:
        x = jnp.pad(x, ((0, pad_tile), (0, 0)))
        Bp += pad_tile
    grid = (Bp // block_b,)

    out = pl.pallas_call(
        _stance_kernel,
        out_shape=jax.ShapeDtypeStruct((Bp, lane_pad), jnp.float32),
        grid=grid,
        in_specs=[
            pl.BlockSpec((block_b, F), lambda i: (i, 0)),
            pl.BlockSpec((F, lane_pad), lambda i: (0, 0)),
            pl.BlockSpec((1, lane_pad), lambda i: (0, 0)),
        ],
        out_specs=pl.BlockSpec((block_b, lane_pad), lambda i: (i, 0)),
        compiler_params=pltpu.CompilerParams(
            dimension_semantics=("parallel",),
        ),
        cost_estimate=_cost(Bp),
    )(x, w_padded, b_padded)
    return out[:B, :out_features]


def init_params(key, image_embed_size, text_embed_size, out_features=3):
    """Deterministic init mimicking nn.Linear defaults (uniform(-1/sqrt(in), 1/sqrt(in)))."""
    in_features = image_embed_size + text_embed_size
    kw, kb = jax.random.split(key)
    bound = 1.0 / math.sqrt(in_features)
    weight = jax.random.uniform(
        kw, (out_features, in_features), jnp.float32, minval=-bound, maxval=bound
    )
    bias = jax.random.uniform(
        kb, (out_features,), jnp.float32, minval=-bound, maxval=bound
    )
    return weight, bias


if __name__ == "__main__":
    key = jax.random.PRNGKey(0)
    k_x, k_p = jax.random.split(key)

    image_embed_size = 32
    text_embed_size = 32
    batch = 8
    in_features = image_embed_size + text_embed_size

    x = jax.random.normal(k_x, (batch, in_features), jnp.float32)
    weight, bias = init_params(k_p, image_embed_size, text_embed_size)

    # One-time layout prep (transpose + lane padding), hoisted out of the forward.
    w_padded, b_padded = prepare_params(weight, bias)

    out = stance_classifier_forward(x, w_padded, b_padded)
    out = jax.block_until_ready(out)

    # Reference check in plain JAX (same math as the PyTorch forward).
    ref = jnp.maximum(x @ weight.T + bias, 0.0)
    assert out.shape == (batch, 3)
    assert jnp.allclose(out, ref, atol=1e-5), "mismatch vs reference"

    print("KERNEL_OK")
</pallas_src>

<mosaic_0001>
module attributes {stable_mosaic.version = 11 : i64} {
  func.func @_stance_kernel(%arg0: memref<8x64xf32, #tpu.memory_space<vmem>>, %arg1: memref<64x128xf32, #tpu.memory_space<vmem>>, %arg2: memref<1x128xf32, #tpu.memory_space<vmem>>, %arg3: memref<8x128xf32, #tpu.memory_space<vmem>>) attributes {dimension_semantics = [], scalar_prefetch = 0 : i64, scratch_operands = 0 : i64, tpu.core_type = #tpu.core_type<tc>} {
    %c0 = arith.constant 0 : index
    %c0_0 = arith.constant 0 : index
    %0 = vector.load %arg0[%c0, %c0_0] : memref<8x64xf32, #tpu.memory_space<vmem>>, vector<8x64xf32>
    %c0_1 = arith.constant 0 : index
    %c0_2 = arith.constant 0 : index
    %1 = vector.load %arg1[%c0_1, %c0_2] : memref<64x128xf32, #tpu.memory_space<vmem>>, vector<64x128xf32>
    %c0_3 = arith.constant 0 : index
    %c0_4 = arith.constant 0 : index
    %2 = vector.load %arg2[%c0_3, %c0_4] : memref<1x128xf32, #tpu.memory_space<vmem>>, vector<1x128xf32>
    %cst = arith.constant dense<0.000000e+00> : vector<8x128xf32>
    %3 = tpu.matmul %0, %1, %cst {dimension_numbers = #tpu.dot_dimension_numbers<[1], [0], [0], [1], [0, 0, 1, 1], [], []>} : vector<8x64xf32>, vector<64x128xf32>, vector<8x128xf32> -> vector<8x128xf32>
    %4 = vector.broadcast %2 : vector<1x128xf32> to vector<8x128xf32>
    %5 = arith.addf %3, %4 : vector<8x128xf32>
    %cst_5 = arith.constant 0.000000e+00 : f32
    %6 = vector.broadcast %cst_5 : f32 to vector<8x128xf32>
    %7 = arith.maximumf %5, %6 : vector<8x128xf32>
    %c0_6 = arith.constant 0 : index
    %c0_7 = arith.constant 0 : index
    %8 = vector.load %arg3[%c0_6, %c0_7] : memref<8x128xf32, #tpu.memory_space<vmem>>, vector<8x128xf32>
    tpu.vector_store %arg3[%c0_6, %c0_7], %7 {strides = array<i32>} : memref<8x128xf32, #tpu.memory_space<vmem>>, vector<8x128xf32>,
    return
  }
}

</mosaic_0001>

<bundles_post_ra>
// kernel: tpu_custom_call.1
= control target key start
LH: loop header
LB: loop body
LE: loop exit
PB: predicated region body
PF: predicated region fallthrough
CT: control target
= control target key end

     0   :  { %8 = vsyncpa [#allocation3], 0  ;;  %s291_s0 = inlined_call_operand.hbm [shape: f32[8,64], index: 0, kind: input, shape index: {}]   ;;  %s292_s1 = inlined_call_operand.hbm [shape: f32[64,128], index: 1, kind: input, shape index: {}]   ;;  %s293_s2 = inlined_call_operand.vmem [shape: f32[1,128], index: 2, kind: input, shape index: {}]   ;;  %s294_s3 = inlined_call_operand.hbm [shape: f32[8,128], index: 3, kind: output, shape index: {}]  }
   0x1   :  { %9 = vsyncpa [#allocation6], 0 }
   0x2   :  { %10 = vsyncpa [#allocation4], 0  ;;  %s252_s12 = smov [#allocation2]   ;;  %s253_s14 = smov [#allocation5]  }
   0x3   :  { %s17_s13 = sshll.u32 %s252_s12, 4  ;;  %s26_s15 = sshll.u32 %s253_s14, 4  ;;  %s18_s13 = int_to_ptr.vmem [resolvable:$true] %s17_s13  ;;  %s27_s15 = int_to_ptr.vmem [resolvable:$true] %s26_s15 }
   0x4   :  { %s194_s16 = scalar_lea.vmem %s18_s13, 128  ;;  %p199_p1 = scmp.lt.s32.totalorder %s18_s13, %s18_s13 }
   0x5   :  { %p195_p0 = scmp.ne.s32.totalorder %s18_s13, %s194_s16  ;;  %p200_p2 = scmp.lt.s32.totalorder %s194_s16, %s194_s16 }
   0x7   :  { %p201_p3 = por %p200_p2, %p199_p1 }
   0x9   :  { %p202_p4 = pnand %p201_p3, %p195_p0 }
   0xb   :  { %205 = shalt.err (!%p202_p4)
}
   0xc   :  { %20 = dma.hbm_to_vmem [thread:$0]  %s291_s0, 128, %s18_s13, [#allocation3]  }
   0xd   :  { %s214_s19 = scalar_lea.vmem %s27_s15, 1024  ;;  %p219_p6 = scmp.lt.s32.totalorder %s27_s15, %s27_s15 }
   0xe   :  { %p215_p5 = scmp.ne.s32.totalorder %s27_s15, %s214_s19  ;;  %p220_p7 = scmp.lt.s32.totalorder %s214_s19, %s214_s19 }
  0x10   :  { %p221_p8 = por %p220_p7, %p219_p6 }
  0x12   :  { %p222_p9 = pnand %p221_p8, %p215_p5 }
  0x14   :  { %225 = shalt.err (!%p222_p9)
}
  0x15   :  { %s254_s20 = smov 128   ;;  %s255_s21 = smov 8  }
  0x16   :  { %32 = dma.hbm_to_vmem [thread:$0]  %s292_s1, 1024, %s27_s15, [#allocation6], %s254_s20, %s254_s20, %s255_s21  }
  0x17   :  { %246 = dma.done.wait [#allocation3], 128  }
  0x18   :  { %247 = vsyncadd [#allocation3], 4294967168 }
  0x19   :  { %248 = dma.done.wait [#allocation6], 1024  }
  0x1a   :  { %249 = vsyncadd [#allocation6], 4294966272  ;;  %v256_v0 = vmov 0.0   ;;  %vm257_vm0 = vmmov 0   ;;  %v49_v1 = vld [vmem:[#allocation5 + $0x38] sm:$0xff]  ;;  %v48_v2 = vld [vmem:[#allocation5 + $0x30] sm:$0xff] }
  0x1b   :  { %160 = vmatprep.subr.mxu0 %v256_v0  ;;  %176 = vmatprep.mubr.msk.f32.mxu0 %vm257_vm0, %v256_v0  ;;  %v47_v3 = vld [vmem:[#allocation5 + $0x28] sm:$0xff]  ;;  %v46_v4 = vld [vmem:[#allocation5 + $0x20] sm:$0xff]  ;;  %v45_v5 = vld [vmem:[#allocation5 + $0x18] sm:$0xff]  ;;  %vm57_vm1 = vcmask 523264   ;;  %s258_s24 = smov [#allocation7]  }
  0x1c   :  { %161 = vmatpush3.msra.mxu0 %v49_v1  ;;  %v44_v6 = vld [vmem:[#allocation5 + $0x10] sm:$0xff]  ;;  %v43_v7 = vld [vmem:[#allocation5 + $0x8] sm:$0xff]  ;;  %v42_v8 = vld [vmem:[#allocation5] sm:$0xff]  ;;  %s139_s25 = sshll.u32 %s258_s24, 4  ;;  %s140_s25 = int_to_ptr.vmem [resolvable:$true] %s139_s25 }
  0x1d   :  { %162 = vmatprep.subr.mxu0 %v256_v0  ;;  %v41_v9 = vld [vmem:[#allocation2] sm:$0xff]  ;;  %s226_s26 = scalar_lea.vmem %s140_s25, 128  ;;  %p231_p11 = scmp.lt.s32.totalorder %s140_s25, %s140_s25 }
  0x1e   :  { %163 = vmatpush3.msra.mxu0 %v48_v2  ;;  %v149_v10 = vld [vmem:[%s293_s2] ss:$0 sm:$0xff]  ;;  %p227_p10 = scmp.ne.s32.totalorder %s140_s25, %s226_s26  ;;  %p232_p12 = scmp.lt.s32.totalorder %s226_s26, %s226_s26 }
  0x1f   :  { %164 = vmatprep.subr.mxu0 %v256_v0 }
  0x20   :  { %165 = vmatpush3.msra.mxu0 %v47_v3  ;;  %p233_p13 = por %p232_p12, %p231_p11 }
  0x21   :  { %166 = vmatprep.subr.mxu0 %v256_v0 }
  0x22   :  { %167 = vmatpush3.msra.mxu0 %v46_v4  ;;  %p234_p0 = pnand %p233_p13, %p227_p10 }
  0x23   :  { %168 = vmatprep.subr.mxu0 %v256_v0 }
  0x24   :  { %169 = vmatpush3.msra.mxu0 %v45_v5 }
  0x25   :  { %170 = vmatprep.subr.mxu0 %v256_v0 }
  0x26   :  { %171 = vmatpush3.msra.mxu0 %v44_v6 }
  0x27   :  { %172 = vmatprep.subr.mxu0 %v256_v0 }
  0x28   :  { %173 = vmatpush3.msra.mxu0 %v43_v7 }
  0x29   :  { %174 = vmatprep.subr.mxu0 %v256_v0 }
  0x2a   :  { %175 = vmatpush3.msra.mxu0 %v42_v8 }
  0x2b   :  { %177 = vmatmul.mubr.msk.f32.vlgmr.msra.gmra.mxu0 %vm57_vm1, %v41_v9 }
  0xeb   :  { %v127_v11 = vpop.f32.mrf.mxu0 }
  0xec   :  { %v128_v12 = vadd.f32 %v149_v10, %v127_v11 }
  0xed   :  { %v178_v13 = vpop.f32.mrf.mxu0 }
  0xee   :  { %v131_v14 = vmax.f32 %v128_v12, 0.0 }
  0xf0   :  { %132 = vst [vmem:[#allocation7] sm:$0xff] %v131_v14 }
  0xf1   :  { %237 = shalt.err (!%p234_p0)
}
  0xf2   :  { %142 = dma.vmem_to_hbm [thread:$0]  %s140_s25, 128, %s294_s3, [#allocation4]  }
  0xf3   :  { %250 = dma.done.wait [#allocation4], 128  }
  0xf4   :  { %251 = vsyncadd [#allocation4], 4294967168 }
  0xf5   :  { %146 = vsyncpa [#allocation3], 1 }
  0xf6   :  { %147 = vsyncpa [#allocation6], 1 }
  0xf7   :  { %148 = vsyncpa [#allocation4], 1 }

</bundles_post_ra>
